<compile_context>
chip_gen: v5e
topology: v5e:2x2
jax: 0.10.0
libtpu: 0.0.40
codegen_flags: <defaults>
</compile_context>

<pallas_src>
import functools

import jax
import jax.numpy as jnp
from jax.experimental import pallas as pl
from jax.experimental.pallas import tpu as pltpu

NEG_BIG = 1e30         # plain Python float (NOT a traced jnp scalar)
LEAKY_SLOPE = 0.2


# ---------------------------------------------------------------------------
# Kernels
# ---------------------------------------------------------------------------
def _gat1_kernel(heads, head_dim,
                 adst_ref, asrc_ref, xpa_ref, adj_ref, b1_ref,
                 out_ref, m_scr, acc_scr):
    """First GATConv (multi-head, concat=True) attention core, fused with the ReLU.

    Grid: (dst row tiles ["parallel"], src column tiles ["arbitrary"]).
      adst [H, TM, 1]  f32   per-head destination coefficients for this dst tile
      asrc [H, 1, TN]  f32   per-head source coefficients for this src tile
      xpa  [H, TN, Dh+1] bf16 projected sources per head, augmented with a ones column
      adj  [TM, TN] int8     adj[i, j] = 1 iff edge j -> i (incl. self loops)
      b1   [1, H*Dh] f32
      out  [TM, H*Dh] bf16   written on the last src step only
      m_scr [H, TM, 1] f32, acc_scr [H, TM, Dh+1] f32  online-softmax running state
    """
    j = pl.program_id(1)

    @pl.when(j == 0)
    def _():
        m_scr[...] = jnp.full_like(m_scr, -jnp.inf)
        acc_scr[...] = jnp.zeros_like(acc_scr)

    # Additive adjacency mask: built once per (tm, tn) block, shared by all heads.
    mask_add = (adj_ref[...].astype(jnp.float32) - 1.0) * NEG_BIG        # [TM, TN]

    for h in range(heads):
        s = adst_ref[h] + asrc_ref[h]                                    # [TM, TN]
        s = jnp.maximum(s, LEAKY_SLOPE * s)                              # LeakyReLU(0.2)
        s = s + mask_add
        m_prev = m_scr[h]                                                # [TM, 1]
        m_new = jnp.maximum(m_prev, jnp.max(s, axis=-1, keepdims=True))
        alpha = jnp.exp(m_prev - m_new)                                  # rescale factor
        e = jnp.exp(s - m_new)                                           # [TM, TN]
        # Numerator AND softmax denominator in one MXU matmul (ones column in xpa).
        contrib = jnp.dot(e.astype(jnp.bfloat16), xpa_ref[h],
                          preferred_element_type=jnp.float32)            # [TM, Dh+1]
        acc_scr[h] = alpha * acc_scr[h] + contrib
        m_scr[h] = m_new

    @pl.when(j == pl.num_programs(1) - 1)
    def _():
        outs = []
        for h in range(heads):
            acc = acc_scr[h]                                             # [TM, Dh+1]
            num = acc[:, :head_dim]
            den = acc[:, head_dim:head_dim + 1]
            outs.append(num / den)                                       # [TM, Dh]
        o = jnp.concatenate(outs, axis=-1) + b1_ref[...]                 # [TM, H*Dh]
        # Single lane-dense store, fused ReLU, bf16 intermediate.
        out_ref[...] = jnp.maximum(o, 0.0).astype(out_ref.dtype)


def _gat2_mlp_kernel(d_out,
                     adst_ref, asrc_ref, xpa_ref, adj_ref, b2_ref,
                     wl1_ref, bl1_ref, wl2_ref, bl2_ref,
                     out_ref, m_scr, acc_scr):
    """Second GATConv (1 head, concat=False) fused with lin1 -> ReLU -> lin2 -> softmax."""
    j = pl.program_id(1)

    @pl.when(j == 0)
    def _():
        m_scr[...] = jnp.full_like(m_scr, -jnp.inf)
        acc_scr[...] = jnp.zeros_like(acc_scr)

    mask_add = (adj_ref[...].astype(jnp.float32) - 1.0) * NEG_BIG        # [TM, TN]

    s = adst_ref[0] + asrc_ref[0]                                        # [TM, TN]
    s = jnp.maximum(s, LEAKY_SLOPE * s) + mask_add
    m_prev = m_scr[0]
    m_new = jnp.maximum(m_prev, jnp.max(s, axis=-1, keepdims=True))
    alpha = jnp.exp(m_prev - m_new)
    e = jnp.exp(s - m_new)
    contrib = jnp.dot(e.astype(jnp.bfloat16), xpa_ref[0],
                      preferred_element_type=jnp.float32)                # [TM, D2+1]
    acc_scr[0] = alpha * acc_scr[0] + contrib
    m_scr[0] = m_new

    @pl.when(j == pl.num_programs(1) - 1)
    def _():
        acc = acc_scr[0]
        h2 = acc[:, :d_out] / acc[:, d_out:d_out + 1] + b2_ref[...]      # [TM, D2]
        # Tiny fused MLP head (f32 matmuls; MXU has plenty of slack here).
        z = jnp.dot(h2, wl1_ref[...], preferred_element_type=jnp.float32) + bl1_ref[...]
        z = jnp.maximum(z, 0.0)
        z = jnp.dot(z, wl2_ref[...], preferred_element_type=jnp.float32) + bl2_ref[...]
        z = z - jnp.max(z, axis=-1, keepdims=True)
        ez = jnp.exp(z)
        # Exact normalization for the FINAL softmax: probability rows sum to 1.
        out_ref[...] = ez / jnp.sum(ez, axis=-1, keepdims=True)


# ---------------------------------------------------------------------------
# Host-side (once-per-layer) precompute and launch plumbing
# ---------------------------------------------------------------------------
def _bf16_matmul(a, b):
    """Hoisted XLA matmul with bf16 operands and f32 accumulation (runs once per layer)."""
    return jnp.dot(a.astype(jnp.bfloat16), b.astype(jnp.bfloat16),
                   preferred_element_type=jnp.float32)


def _attention_precompute(xp, att_src, att_dst):
    """xp [N, H*Dh] f32, att_* [H, Dh] ->
       a_dst [H, N, 1] f32, a_src [H, 1, N] f32, xp_aug [H, N, Dh+1] bf16
    where xp_aug[h] = [x'_h | 1] so dot(e, xp_aug[h]) yields numerator and softmax
    denominator in a single MXU pass."""
    n = xp.shape[0]
    heads, dh = att_src.shape
    xph = xp.reshape(n, heads, dh)
    a_src = jnp.einsum("nhd,hd->hn", xph, att_src)[:, None, :]           # (H, 1, N)
    a_dst = jnp.einsum("nhd,hd->hn", xph, att_dst)[:, :, None]           # (H, N, 1)
    ones = jnp.ones((heads, n, 1), jnp.float32)
    xp_aug = jnp.concatenate([xph.transpose(1, 0, 2), ones], axis=-1).astype(jnp.bfloat16)
    return a_dst, a_src, xp_aug


def _pick_dst_tile(n, max_tile):
    """Largest row tile <= max_tile that divides n, clamped to >=32 rows so the int8
    adjacency block respects sublane packing. Falls back to a single tile of n rows."""
    if n <= max_tile:
        return n
    for t in (1024, 512, 256, 128, 64, 32):
        if t <= max_tile and n % t == 0:
            return t
    return n   # TODO(synk): pad N instead of silently falling back to one big tile.


def _pick_src_tile(n, max_tile):
    """Source-column tile: must be a multiple of 128 lanes or the full width."""
    if n <= max_tile:
        return n
    for t in (2048, 1024, 512, 256, 128):
        if t <= max_tile and n % t == 0:
            return t
    return n   # TODO(synk): pad N to a multiple of 128 for ragged graph sizes.


def _compiler_params():
    # Scoped-VMEM budget derived from the chip: ~48 MiB on v7x (64 MiB physical),
    # 64 MiB on v5e / v6e (128 MiB physical). Conservative fallback off-TPU / interpret.
    try:
        cap = int(pltpu.get_tpu_info().vmem_capacity_bytes)
    except Exception:
        cap = 64 * 1024 * 1024
    limit = min(64 * 1024 * 1024, max(32 * 1024 * 1024, cap - 16 * 1024 * 1024))
    return pltpu.CompilerParams(
        # dst-row tiles independent ("parallel" -> megacore), src axis is the reduction.
        dimension_semantics=("parallel", "arbitrary"),
        vmem_limit_bytes=limit)


def gat_forward(x, adj_i8, params, heads, hidden_dim, row_tile=256, src_tile=512):
    """Full GAT forward. adj_i8: int8 [N, N] with adj[dst, src] = 1 (incl. self loops)."""
    n = x.shape[0]
    nh, dh = heads, hidden_dim
    d_hid = nh * dh
    d_out = params["wl2"].shape[1]

    tm = _pick_dst_tile(n, row_tile)
    tn = _pick_src_tile(n, src_tile)
    grid = (pl.cdiv(n, tm), pl.cdiv(n, tn))
    cparams = _compiler_params()

    full2 = lambda i, j: (0, 0)

    # ---- layer 1: hoisted projection + coefficients (once), attention kernel + ReLU ----
    xp1 = _bf16_matmul(x, params["w1"])                                   # [N, H*Dh] f32
    adst1, asrc1, xpa1 = _attention_precompute(xp1, params["as1"], params["ad1"])

    h1 = pl.pallas_call(
        functools.partial(_gat1_kernel, nh, dh),
        out_shape=jax.ShapeDtypeStruct((n, d_hid), jnp.bfloat16),         # bf16 intermediate
        grid=grid,
        in_specs=[
            pl.BlockSpec((nh, tm, 1), lambda i, j: (0, i, 0)),            # a_dst (dst tile)
            pl.BlockSpec((nh, 1, tn), lambda i, j: (0, 0, j)),            # a_src (src tile)
            pl.BlockSpec((nh, tn, dh + 1), lambda i, j: (0, j, 0)),       # [x'_h | 1]
            pl.BlockSpec((tm, tn), lambda i, j: (i, j)),                  # int8 adjacency
            pl.BlockSpec((1, d_hid), full2),                              # bias1
        ],
        out_specs=pl.BlockSpec((tm, d_hid), lambda i, j: (i, 0)),
        scratch_shapes=[pltpu.VMEM((nh, tm, 1), jnp.float32),             # running max
                        pltpu.VMEM((nh, tm, dh + 1), jnp.float32)],       # running num|den
        compiler_params=cparams,
    )(adst1, asrc1, xpa1, adj_i8, params["b1"])

    # ---- layer 2: hoisted projection + coefficients, attention + fused MLP head ----
    xp2 = _bf16_matmul(h1, params["w2"])                                  # [N, d_out] f32
    adst2, asrc2, xpa2 = _attention_precompute(xp2, params["as2"], params["ad2"])

    out = pl.pallas_call(
        functools.partial(_gat2_mlp_kernel, d_out),
        out_shape=jax.ShapeDtypeStruct((n, d_out), jnp.float32),
        grid=grid,
        in_specs=[
            pl.BlockSpec((1, tm, 1), lambda i, j: (0, i, 0)),
            pl.BlockSpec((1, 1, tn), lambda i, j: (0, 0, j)),
            pl.BlockSpec((1, tn, d_out + 1), lambda i, j: (0, j, 0)),
            pl.BlockSpec((tm, tn), lambda i, j: (i, j)),
            pl.BlockSpec((1, d_out), full2),                              # bias2
            pl.BlockSpec((d_out, hidden_dim), full2),                     # lin1 W
            pl.BlockSpec((1, hidden_dim), full2),                         # lin1 b
            pl.BlockSpec((hidden_dim, d_out), full2),                     # lin2 W
            pl.BlockSpec((1, d_out), full2),                              # lin2 b
        ],
        out_specs=pl.BlockSpec((tm, d_out), lambda i, j: (i, 0)),
        scratch_shapes=[pltpu.VMEM((1, tm, 1), jnp.float32),
                        pltpu.VMEM((1, tm, d_out + 1), jnp.float32)],
        compiler_params=cparams,
    )(adst2, asrc2, xpa2, adj_i8, params["b2"],
      params["wl1"], params["bl1"], params["wl2"], params["bl2"])
    return out


# ---------------------------------------------------------------------------
# Graph / parameter helpers + pure-JAX reference
# ---------------------------------------------------------------------------
def edge_index_to_adj(edge_index, num_nodes):
    """adj[dst, src] = 1 for every edge src->dst; PyG GATConv adds self loops. int8 mask."""
    src, dst = edge_index[0], edge_index[1]
    adj = jnp.zeros((num_nodes, num_nodes), jnp.int8).at[dst, src].set(1)
    adj = jnp.maximum(adj, jnp.eye(num_nodes, dtype=jnp.int8))
    return adj


def init_params(key, input_dim, hidden_dim, output_dim, heads):
    ks = jax.random.split(key, 12)
    n = lambda k, shape: (0.1 * jax.random.normal(k, shape)).astype(jnp.float32)
    return {
        # GATConv 1: in -> heads * hidden (concat)
        "w1":  n(ks[0], (input_dim, heads * hidden_dim)),
        "as1": n(ks[1], (heads, hidden_dim)),
        "ad1": n(ks[2], (heads, hidden_dim)),
        "b1":  n(ks[3], (1, heads * hidden_dim)),
        # GATConv 2: heads*hidden -> output (heads=1, no concat)
        "w2":  n(ks[4], (heads * hidden_dim, output_dim)),
        "as2": n(ks[5], (1, output_dim)),
        "ad2": n(ks[6], (1, output_dim)),
        "b2":  n(ks[7], (1, output_dim)),
        # lin1: output_dim -> hidden_dim ; lin2: hidden_dim -> output_dim
        "wl1": n(ks[8], (output_dim, hidden_dim)),
        "bl1": n(ks[9], (1, hidden_dim)),
        "wl2": n(ks[10], (hidden_dim, output_dim)),
        "bl2": n(ks[11], (1, output_dim)),
    }


def gat_reference(x, adj_i8, params, heads, hidden_dim):
    """Pure-JAX f32 reference (no Pallas) for correctness checking."""
    adjf = adj_i8.astype(jnp.float32)

    def layer(h, W, a_s, a_d, b, H, concat):
        xp = h @ W
        Dh = W.shape[1] // H
        outs = []
        for hh in range(H):
            xh = xp[:, hh * Dh:(hh + 1) * Dh]
            asrc = xh @ a_s[hh]
            adst = xh @ a_d[hh]
            s = adst[:, None] + asrc[None, :]
            s = jnp.where(s > 0, s, 0.2 * s)
            s = jnp.where(adjf > 0, s, -1e30)
            p = jax.nn.softmax(s, axis=-1)
            outs.append(p @ xh)
        o = jnp.concatenate(outs, axis=-1) if concat else sum(outs) / H
        return o + b

    h1 = jax.nn.relu(layer(x, params["w1"], params["as1"], params["ad1"],
                           params["b1"], heads, True))
    h2 = layer(h1, params["w2"], params["as2"], params["ad2"], params["b2"], 1, False)
    z = jax.nn.relu(h2 @ params["wl1"] + params["bl1"])
    z = z @ params["wl2"] + params["bl2"]
    return jax.nn.softmax(z, axis=-1)


if __name__ == "__main__":
    N, INPUT_DIM, HIDDEN_DIM, OUTPUT_DIM, HEADS = 64, 8, 16, 8, 2
    ROW_TILE = 32   # -> grid of (2 destination-row tiles, 1 source tile)

    key = jax.random.PRNGKey(0)
    k_x, k_p = jax.random.split(key)

    x = jax.random.normal(k_x, (N, INPUT_DIM), dtype=jnp.float32)

    # Deterministic ring graph (both directions), unique edges.
    src = jnp.arange(N, dtype=jnp.int32)
    dst = (src + 1) % N
    edge_index = jnp.stack([jnp.concatenate([src, dst]),
                            jnp.concatenate([dst, src])], axis=0)   # [2, 2N]
    adj = edge_index_to_adj(edge_index, N)                          # int8, incl. self loops

    params = init_params(k_p, INPUT_DIM, HIDDEN_DIM, OUTPUT_DIM, HEADS)

    out = gat_forward(x, adj, params, HEADS, HIDDEN_DIM, row_tile=ROW_TILE)
    out = jax.block_until_ready(out)

    ref = gat_reference(x, adj, params, HEADS, HIDDEN_DIM)

    assert out.shape == (N, OUTPUT_DIM)
    assert bool(jnp.all(jnp.isfinite(out)))
    # Final softmax uses exact normalization -> rows sum to 1 tightly.
    assert bool(jnp.allclose(jnp.sum(out, axis=-1), 1.0, atol=1e-3))
    # Match the pure-f32 reference within bf16-matmul tolerance.
    assert bool(jnp.max(jnp.abs(out - ref)) < 5e-2)
    print("KERNEL_OK")
</pallas_src>

<mosaic_0001>
module attributes {stable_mosaic.version = 11 : i64} {
  func.func @_gat1_kernel(%arg0: i32, %arg1: i32, %arg2: memref<2x32x1xf32, #tpu.memory_space<vmem>>, %arg3: memref<2x1x64xf32, #tpu.memory_space<vmem>>, %arg4: memref<2x64x17xbf16, #tpu.memory_space<vmem>>, %arg5: memref<32x64xi8, #tpu.memory_space<vmem>>, %arg6: memref<1x32xf32, #tpu.memory_space<vmem>>, %arg7: memref<32x32xbf16, #tpu.memory_space<vmem>>, %arg8: memref<2x32x1xf32, #tpu.memory_space<vmem>>, %arg9: memref<2x32x17xf32, #tpu.memory_space<vmem>>) attributes {dimension_semantics = [#tpu.dimension_semantics<parallel>, #tpu.dimension_semantics<arbitrary>], iteration_bounds = array<i64: 2, 1>, scalar_prefetch = 0 : i64, scratch_operands = 2 : i64, tpu.core_type = #tpu.core_type<tc>, window_params = [{transform_indices = @transform_0, window_bounds = array<i64: 2, 32, 1>}, {transform_indices = @transform_1, window_bounds = array<i64: 2, 1, 64>}, {transform_indices = @transform_2, window_bounds = array<i64: 2, 64, 17>}, {transform_indices = @transform_3, window_bounds = array<i64: 32, 64>}, {pipeline_mode = #tpu.pipeline_mode<synchronous>, transform_indices = @transform_4, window_bounds = array<i64: 1, 32>}, {transform_indices = @transform_5, window_bounds = array<i64: 32, 32>}]} {
    %c0_i32 = arith.constant 0 : i32
    %0 = arith.cmpi eq, %arg1, %c0_i32 : i32
    %1 = arith.extui %0 : i1 to i32
    %c0_i32_0 = arith.constant 0 : i32
    %2 = arith.cmpi ne, %1, %c0_i32_0 : i32
    scf.if %2 {
      %cst_52 = arith.constant 0xFF800000 : f32
      %84 = vector.broadcast %cst_52 : f32 to vector<2x32x1xf32>
      %c0_53 = arith.constant 0 : index
      %c0_54 = arith.constant 0 : index
      %c0_55 = arith.constant 0 : index
      %85 = vector.load %arg8[%c0_53, %c0_54, %c0_55] : memref<2x32x1xf32, #tpu.memory_space<vmem>>, vector<2x32x1xf32>
      tpu.vector_store %arg8[%c0_53, %c0_54, %c0_55], %84 {strides = array<i32>} : memref<2x32x1xf32, #tpu.memory_space<vmem>>, vector<2x32x1xf32>,
      %cst_56 = arith.constant 0.000000e+00 : f32
      %86 = vector.broadcast %cst_56 : f32 to vector<2x32x17xf32>
      %c0_57 = arith.constant 0 : index
      %c0_58 = arith.constant 0 : index
      %c0_59 = arith.constant 0 : index
      %87 = vector.load %arg9[%c0_57, %c0_58, %c0_59] : memref<2x32x17xf32, #tpu.memory_space<vmem>>, vector<2x32x17xf32>
      tpu.vector_store %arg9[%c0_57, %c0_58, %c0_59], %86 {strides = array<i32>} : memref<2x32x17xf32, #tpu.memory_space<vmem>>, vector<2x32x17xf32>,
    } else {
    }
    %c0 = arith.constant 0 : index
    %c0_1 = arith.constant 0 : index
    %3 = vector.load %arg5[%c0, %c0_1] : memref<32x64xi8, #tpu.memory_space<vmem>>, vector<32x64xi8>
    %4 = arith.sitofp %3 : vector<32x64xi8> to vector<32x64xf32>
    %cst = arith.constant 1.000000e+00 : f32
    %5 = vector.broadcast %cst : f32 to vector<32x64xf32>
    %6 = arith.subf %4, %5 : vector<32x64xf32>
    %cst_2 = arith.constant 1.000000e+30 : f32
    %7 = vector.broadcast %cst_2 : f32 to vector<32x64xf32>
    %8 = arith.mulf %6, %7 : vector<32x64xf32>
    %c0_3 = arith.constant 0 : index
    %c0_4 = arith.constant 0 : index
    %c0_5 = arith.constant 0 : index
    %9 = vector.load %arg2[%c0_3, %c0_4, %c0_5] : memref<2x32x1xf32, #tpu.memory_space<vmem>>, vector<1x32x1xf32>
    %10 = vector.shape_cast %9 : vector<1x32x1xf32> to vector<32x1xf32>
    %c0_6 = arith.constant 0 : index
    %c0_7 = arith.constant 0 : index
    %c0_8 = arith.constant 0 : index
    %11 = vector.load %arg3[%c0_6, %c0_7, %c0_8] : memref<2x1x64xf32, #tpu.memory_space<vmem>>, vector<1x1x64xf32>
    %12 = vector.shape_cast %11 : vector<1x1x64xf32> to vector<1x64xf32>
    %13 = vector.broadcast %10 : vector<32x1xf32> to vector<32x64xf32>
    %14 = vector.broadcast %12 : vector<1x64xf32> to vector<32x64xf32>
    %15 = arith.addf %13, %14 : vector<32x64xf32>
    %cst_9 = arith.constant 2.000000e-01 : f32
    %16 = vector.broadcast %cst_9 : f32 to vector<32x64xf32>
    %17 = arith.mulf %16, %15 : vector<32x64xf32>
    %18 = arith.maximumf %15, %17 : vector<32x64xf32>
    %19 = arith.addf %18, %8 : vector<32x64xf32>
    %c0_10 = arith.constant 0 : index
    %c0_11 = arith.constant 0 : index
    %c0_12 = arith.constant 0 : index
    %20 = vector.load %arg8[%c0_10, %c0_11, %c0_12] : memref<2x32x1xf32, #tpu.memory_space<vmem>>, vector<1x32x1xf32>
    %21 = vector.shape_cast %20 : vector<1x32x1xf32> to vector<32x1xf32>
    %cst_13 = arith.constant dense<0xFF800000> : vector<32xf32>
    %22 = vector.multi_reduction <maximumf>, %19, %cst_13 [1] : vector<32x64xf32> to vector<32xf32>
    %23 = vector.shape_cast %22 : vector<32xf32> to vector<32x1xf32>
    %24 = arith.maximumf %21, %23 : vector<32x1xf32>
    %25 = arith.subf %21, %24 : vector<32x1xf32>
    %26 = math.exp %25 : vector<32x1xf32>
    %27 = vector.broadcast %24 : vector<32x1xf32> to vector<32x64xf32>
    %28 = arith.subf %19, %27 : vector<32x64xf32>
    %29 = math.exp %28 : vector<32x64xf32>
    %30 = arith.truncf %29 : vector<32x64xf32> to vector<32x64xbf16>
    %c0_14 = arith.constant 0 : index
    %c0_15 = arith.constant 0 : index
    %c0_16 = arith.constant 0 : index
    %31 = vector.load %arg4[%c0_14, %c0_15, %c0_16] : memref<2x64x17xbf16, #tpu.memory_space<vmem>>, vector<1x64x17xbf16>
    %32 = vector.shape_cast %31 : vector<1x64x17xbf16> to vector<64x17xbf16>
    %cst_17 = arith.constant dense<0.000000e+00> : vector<32x17xf32>
    %33 = tpu.matmul %30, %32, %cst_17 {dimension_numbers = #tpu.dot_dimension_numbers<[1], [0], [0], [1], [0, 0, 1, 1], [], []>} : vector<32x64xbf16>, vector<64x17xbf16>, vector<32x17xf32> -> vector<32x17xf32>
    %c0_18 = arith.constant 0 : index
    %c0_19 = arith.constant 0 : index
    %c0_20 = arith.constant 0 : index
    %34 = vector.load %arg9[%c0_18, %c0_19, %c0_20] : memref<2x32x17xf32, #tpu.memory_space<vmem>>, vector<1x32x17xf32>
    %35 = vector.shape_cast %34 : vector<1x32x17xf32> to vector<32x17xf32>
    %36 = vector.broadcast %26 : vector<32x1xf32> to vector<32x17xf32>
    %37 = arith.mulf %36, %35 : vector<32x17xf32>
    %38 = arith.addf %37, %33 : vector<32x17xf32>
    %c0_21 = arith.constant 0 : index
    %c0_22 = arith.constant 0 : index
    %c0_23 = arith.constant 0 : index
    %39 = vector.load %arg9[%c0_21, %c0_22, %c0_23] : memref<2x32x17xf32, #tpu.memory_space<vmem>>, vector<1x32x17xf32>
    %40 = vector.shape_cast %39 : vector<1x32x17xf32> to vector<32x17xf32>
    %41 = vector.shape_cast %38 : vector<32x17xf32> to vector<1x32x17xf32>
    tpu.vector_store %arg9[%c0_21, %c0_22, %c0_23], %41 {strides = array<i32>} : memref<2x32x17xf32, #tpu.memory_space<vmem>>, vector<1x32x17xf32>,
    %c0_24 = arith.constant 0 : index
    %c0_25 = arith.constant 0 : index
    %c0_26 = arith.constant 0 : index
    %42 = vector.load %arg8[%c0_24, %c0_25, %c0_26] : memref<2x32x1xf32, #tpu.memory_space<vmem>>, vector<1x32x1xf32>
    %43 = vector.shape_cast %42 : vector<1x32x1xf32> to vector<32x1xf32>
    %44 = vector.shape_cast %24 : vector<32x1xf32> to vector<1x32x1xf32>
    tpu.vector_store %arg8[%c0_24, %c0_25, %c0_26], %44 {strides = array<i32>} : memref<2x32x1xf32, #tpu.memory_space<vmem>>, vector<1x32x1xf32>,
    %c1 = arith.constant 1 : index
    %c0_27 = arith.constant 0 : index
    %c0_28 = arith.constant 0 : index
    %45 = vector.load %arg2[%c1, %c0_27, %c0_28] : memref<2x32x1xf32, #tpu.memory_space<vmem>>, vector<1x32x1xf32>
    %46 = vector.shape_cast %45 : vector<1x32x1xf32> to vector<32x1xf32>
    %c1_29 = arith.constant 1 : index
    %c0_30 = arith.constant 0 : index
    %c0_31 = arith.constant 0 : index
    %47 = vector.load %arg3[%c1_29, %c0_30, %c0_31] : memref<2x1x64xf32, #tpu.memory_space<vmem>>, vector<1x1x64xf32>
    %48 = vector.shape_cast %47 : vector<1x1x64xf32> to vector<1x64xf32>
    %49 = vector.broadcast %46 : vector<32x1xf32> to vector<32x64xf32>
    %50 = vector.broadcast %48 : vector<1x64xf32> to vector<32x64xf32>
    %51 = arith.addf %49, %50 : vector<32x64xf32>
    %cst_32 = arith.constant 2.000000e-01 : f32
    %52 = vector.broadcast %cst_32 : f32 to vector<32x64xf32>
    %53 = arith.mulf %52, %51 : vector<32x64xf32>
    %54 = arith.maximumf %51, %53 : vector<32x64xf32>
    %55 = arith.addf %54, %8 : vector<32x64xf32>
    %c1_33 = arith.constant 1 : index
    %c0_34 = arith.constant 0 : index
    %c0_35 = arith.constant 0 : index
    %56 = vector.load %arg8[%c1_33, %c0_34, %c0_35] : memref<2x32x1xf32, #tpu.memory_space<vmem>>, vector<1x32x1xf32>
    %57 = vector.shape_cast %56 : vector<1x32x1xf32> to vector<32x1xf32>
    %cst_36 = arith.constant dense<0xFF800000> : vector<32xf32>
    %58 = vector.multi_reduction <maximumf>, %55, %cst_36 [1] : vector<32x64xf32> to vector<32xf32>
    %59 = vector.shape_cast %58 : vector<32xf32> to vector<32x1xf32>
    %60 = arith.maximumf %57, %59 : vector<32x1xf32>
    %61 = arith.subf %57, %60 : vector<32x1xf32>
    %62 = math.exp %61 : vector<32x1xf32>
    %63 = vector.broadcast %60 : vector<32x1xf32> to vector<32x64xf32>
    %64 = arith.subf %55, %63 : vector<32x64xf32>
    %65 = math.exp %64 : vector<32x64xf32>
    %66 = arith.truncf %65 : vector<32x64xf32> to vector<32x64xbf16>
    %c1_37 = arith.constant 1 : index
    %c0_38 = arith.constant 0 : index
    %c0_39 = arith.constant 0 : index
    %67 = vector.load %arg4[%c1_37, %c0_38, %c0_39] : memref<2x64x17xbf16, #tpu.memory_space<vmem>>, vector<1x64x17xbf16>
    %68 = vector.shape_cast %67 : vector<1x64x17xbf16> to vector<64x17xbf16>
    %cst_40 = arith.constant dense<0.000000e+00> : vector<32x17xf32>
    %69 = tpu.matmul %66, %68, %cst_40 {dimension_numbers = #tpu.dot_dimension_numbers<[1], [0], [0], [1], [0, 0, 1, 1], [], []>} : vector<32x64xbf16>, vector<64x17xbf16>, vector<32x17xf32> -> vector<32x17xf32>
    %c1_41 = arith.constant 1 : index
    %c0_42 = arith.constant 0 : index
    %c0_43 = arith.constant 0 : index
    %70 = vector.load %arg9[%c1_41, %c0_42, %c0_43] : memref<2x32x17xf32, #tpu.memory_space<vmem>>, vector<1x32x17xf32>
    %71 = vector.shape_cast %70 : vector<1x32x17xf32> to vector<32x17xf32>
    %72 = vector.broadcast %62 : vector<32x1xf32> to vector<32x17xf32>
    %73 = arith.mulf %72, %71 : vector<32x17xf32>
    %74 = arith.addf %73, %69 : vector<32x17xf32>
    %c1_44 = arith.constant 1 : index
    %c0_45 = arith.constant 0 : index
    %c0_46 = arith.constant 0 : index
    %75 = vector.load %arg9[%c1_44, %c0_45, %c0_46] : memref<2x32x17xf32, #tpu.memory_space<vmem>>, vector<1x32x17xf32>
    %76 = vector.shape_cast %75 : vector<1x32x17xf32> to vector<32x17xf32>
    %77 = vector.shape_cast %74 : vector<32x17xf32> to vector<1x32x17xf32>
    tpu.vector_store %arg9[%c1_44, %c0_45, %c0_46], %77 {strides = array<i32>} : memref<2x32x17xf32, #tpu.memory_space<vmem>>, vector<1x32x17xf32>,
    %c1_47 = arith.constant 1 : index
    %c0_48 = arith.constant 0 : index
    %c0_49 = arith.constant 0 : index
    %78 = vector.load %arg8[%c1_47, %c0_48, %c0_49] : memref<2x32x1xf32, #tpu.memory_space<vmem>>, vector<1x32x1xf32>
    %79 = vector.shape_cast %78 : vector<1x32x1xf32> to vector<32x1xf32>
    %80 = vector.shape_cast %60 : vector<32x1xf32> to vector<1x32x1xf32>
    tpu.vector_store %arg8[%c1_47, %c0_48, %c0_49], %80 {strides = array<i32>} : memref<2x32x1xf32, #tpu.memory_space<vmem>>, vector<1x32x1xf32>,
    %c0_i32_50 = arith.constant 0 : i32
    %81 = arith.cmpi eq, %arg1, %c0_i32_50 : i32
    %82 = arith.extui %81 : i1 to i32
    %c0_i32_51 = arith.constant 0 : i32
    %83 = arith.cmpi ne, %82, %c0_i32_51 : i32
    scf.if %83 {
      %c0_52 = arith.constant 0 : index
      %c0_53 = arith.constant 0 : index
      %c0_54 = arith.constant 0 : index
      %84 = vector.load %arg9[%c0_52, %c0_53, %c0_54] : memref<2x32x17xf32, #tpu.memory_space<vmem>>, vector<1x32x17xf32>
      %85 = vector.shape_cast %84 : vector<1x32x17xf32> to vector<32x17xf32>
      %86 = vector.extract_strided_slice %85 {offsets = [0, 0], sizes = [32, 16], strides = [1, 1]} : vector<32x17xf32> to vector<32x16xf32>
      %87 = vector.extract_strided_slice %85 {offsets = [0, 16], sizes = [32, 1], strides = [1, 1]} : vector<32x17xf32> to vector<32x1xf32>
      %88 = vector.broadcast %87 : vector<32x1xf32> to vector<32x16xf32>
      %89 = arith.divf %86, %88 : vector<32x16xf32>
      %c1_55 = arith.constant 1 : index
      %c0_56 = arith.constant 0 : index
      %c0_57 = arith.constant 0 : index
      %90 = vector.load %arg9[%c1_55, %c0_56, %c0_57] : memref<2x32x17xf32, #tpu.memory_space<vmem>>, vector<1x32x17xf32>
      %91 = vector.shape_cast %90 : vector<1x32x17xf32> to vector<32x17xf32>
      %92 = vector.extract_strided_slice %91 {offsets = [0, 0], sizes = [32, 16], strides = [1, 1]} : vector<32x17xf32> to vector<32x16xf32>
      %93 = vector.extract_strided_slice %91 {offsets = [0, 16], sizes = [32, 1], strides = [1, 1]} : vector<32x17xf32> to vector<32x1xf32>
      %94 = vector.broadcast %93 : vector<32x1xf32> to vector<32x16xf32>
      %95 = arith.divf %92, %94 : vector<32x16xf32>
      %96 = tpu.concatenate %89, %95 in 1 : vector<32x16xf32>, vector<32x16xf32> -> vector<32x32xf32>
      %c0_58 = arith.constant 0 : index
      %c0_59 = arith.constant 0 : index
      %97 = vector.load %arg6[%c0_58, %c0_59] : memref<1x32xf32, #tpu.memory_space<vmem>>, vector<1x32xf32>
      %98 = vector.broadcast %97 : vector<1x32xf32> to vector<32x32xf32>
      %99 = arith.addf %96, %98 : vector<32x32xf32>
      %cst_60 = arith.constant 0.000000e+00 : f32
      %100 = vector.broadcast %cst_60 : f32 to vector<32x32xf32>
      %101 = arith.maximumf %99, %100 : vector<32x32xf32>
      %102 = arith.truncf %101 : vector<32x32xf32> to vector<32x32xbf16>
      %c0_61 = arith.constant 0 : index
      %c0_62 = arith.constant 0 : index
      %103 = vector.load %arg7[%c0_61, %c0_62] : memref<32x32xbf16, #tpu.memory_space<vmem>>, vector<32x32xbf16>
      tpu.vector_store %arg7[%c0_61, %c0_62], %102 {strides = array<i32>} : memref<32x32xbf16, #tpu.memory_space<vmem>>, vector<32x32xbf16>,
    } else {
    }
    return
  }
  func.func @transform_0(%arg0: i32, %arg1: i32) -> (i32, i32, i32) {
    %c0_i32 = arith.constant 0 : i32
    %c0_i32_0 = arith.constant 0 : i32
    %c0_i32_1 = arith.constant 0 : i32
    return %c0_i32, %arg0, %c0_i32_0 : i32, i32, i32
  }
  func.func @transform_1(%arg0: i32, %arg1: i32) -> (i32, i32, i32) {
    %c0_i32 = arith.constant 0 : i32
    %c0_i32_0 = arith.constant 0 : i32
    %c0_i32_1 = arith.constant 0 : i32
    return %c0_i32, %c0_i32_0, %arg1 : i32, i32, i32
  }
  func.func @transform_2(%arg0: i32, %arg1: i32) -> (i32, i32, i32) {
    %c0_i32 = arith.constant 0 : i32
    %c0_i32_0 = arith.constant 0 : i32
    %c0_i32_1 = arith.constant 0 : i32
    return %c0_i32, %arg1, %c0_i32_0 : i32, i32, i32
  }
  func.func @transform_3(%arg0: i32, %arg1: i32) -> (i32, i32) {
    %c0_i32 = arith.constant 0 : i32
    return %arg0, %arg1 : i32, i32
  }
  func.func @transform_4(%arg0: i32, %arg1: i32) -> (i32, i32) {
    %c0_i32 = arith.constant 0 : i32
    %c0_i32_0 = arith.constant 0 : i32
    %c0_i32_1 = arith.constant 0 : i32
    return %c0_i32, %c0_i32_0 : i32, i32
  }
  func.func @transform_5(%arg0: i32, %arg1: i32) -> (i32, i32) {
    %c0_i32 = arith.constant 0 : i32
    %c0_i32_0 = arith.constant 0 : i32
    return %arg0, %c0_i32 : i32, i32
  }
}

</mosaic_0001>

<bundles_post_ra>
// kernel: tpu_custom_call.1
= control target key start
LH: loop header
LB: loop body
LE: loop exit
PB: predicated region body
PF: predicated region fallthrough
CT: control target
= control target key end

     0   :  { %s1418_s18 = smov 0   ;;  %s1420_s19 = smov 0   ;;  %s1695_s0 = inlined_call_operand.vmem [shape: f32[2,64,1], index: 0, kind: input, shape index: {}]   ;;  %s1696_s1 = inlined_call_operand.vmem [shape: f32[2,1,64], index: 1, kind: input, shape index: {}]   ;;  %s1697_s2 = inlined_call_operand.vmem [shape: bf16[2,64,17], index: 2, kind: input, shape index: {}]   ;;  %s1698_s3 = inlined_call_operand.vmem [shape: s8[64,64], index: 3, kind: input, shape index: {}]   ;;  %s1699_s4 = inlined_call_operand.vmem [shape: f32[1,32], index: 4, kind: input, shape index: {}]   ;;  %s1700_s5 = inlined_call_operand.vmem [shape: bf16[64,32], index: 5, kind: output, shape index: {}]  }
   0x1   :  { %s1422_s20 = smov 0   ;;  %s1424_s21 = smov 0  }
   0x2   :  { %s1426_s22 = smov 0  }
   0x3 LB: > { %s27_s23 = sadd.s32 1, %s1377_s21  ;;  %p41_p1 = scmp.ne.s32.totalorder %s1369_s19, %s1365_s18  ;;  %s1381_s22 = sphi %s1426_s22, %s15_s22   ;;  %s1377_s21 = sphi %s1424_s21, %s1713_s21   ;;  %s1373_s20 = sphi %s1422_s20, %s1712_s20   ;;  %s1369_s19 = sphi %s1420_s19, %s1711_s19   ;;  %s1365_s18 = sphi %s1418_s18, %s1710_s18  }
   0x4   : > { %p29_p0 = scmp.ge.s32.totalorder %s27_s23, 2  ;;  %p42_p2 = scmp.eq.s32.totalorder %s1381_s22, 0 }
   0x5   : > { %s34_s25 = sadd.s32 1, %s1369_s19  ;;  %p1160_p5 = scmp.ge.s32.totalorder %s1381_s22, 2 }
   0x6   : > { %s1715_s23 = smov (%p29_p0, %s27_s23), 0  ;;  %p43_p3 = por %p42_p2, %p41_p1 }
   0x7   : > { %s31_s24 = ssub.s32 %s1377_s21, %s1715_s23  ;;  %212 = sbr.rel (%p1160_p5) target bundleno = 24 (0x18), region = 28 }
   0x8   : > { %p32_p4 = scmp.eq.s32.totalorder %s31_s24, 0 }
   0xa   : > { %s1453_s26 = scalar_select %p32_p4, %s1369_s19, %s34_s25  }
   0xc   : > { %215 = sbr.rel (!%p43_p3) target bundleno = 24 (0x18), region = 32  ;;  %s217_s27 = sand.u32 (%p43_p3), 1, %s1369_s19  }
   0xd   : > { %s1224_s28 = sshll.u32 (%p43_p3), %s1377_s21, 5  ;;  %s1161_s29 = sshll.u32 (%p43_p3), %s217_s27, 6 }
   0xe   : > { %s222_s7 = scalar_lea.vmem (%p43_p3), %s1695_s0, %s1224_s28  ;;  %s219_s8 = scalar_lea.vmem (%p43_p3), [#allocation4], %s1161_s29 }
   0xf   : > { %v265_v0 = vld [vmem:[%s222_s7] sm:$0xff] (%p43_p3)  ;;  %v267_v1 = vld [vmem:[%s222_s7 + $0x8] sm:$0xff] (%p43_p3)  ;;  %v269_v2 = vld [vmem:[%s222_s7 + $0x10] sm:$0xff] (%p43_p3) }
  0x10   : > { %266 = vst [vmem:[%s219_s8] sm:$0xff] (%p43_p3), %v265_v0  ;;  %v271_v3 = vld [vmem:[%s222_s7 + $0x18] sm:$0xff] (%p43_p3)  ;;  %v273_v4 = vld [vmem:[%s222_s7 + $0x40] sm:$0xff] (%p43_p3)  ;;  %v275_v5 = vld [vmem:[%s222_s7 + $0x48] sm:$0xff] (%p43_p3) }
  0x11   : > { %268 = vst [vmem:[%s219_s8 + $0x8] sm:$0xff] %v267_v1  ;;  %v277_v6 = vld [vmem:[%s222_s7 + $0x50] sm:$0xff]  ;;  %v279_v7 = vld [vmem:[%s222_s7 + $0x58] sm:$0xff] }
  0x12   : > { %270 = vst [vmem:[%s219_s8 + $0x10] sm:$0xff] %v269_v2 }
  0x13   : > { %272 = vst [vmem:[%s219_s8 + $0x18] sm:$0xff] %v271_v3 }
  0x14   : > { %274 = vst [vmem:[%s219_s8 + $0x20] sm:$0xff] %v273_v4 }
  0x15   : > { %276 = vst [vmem:[%s219_s8 + $0x28] sm:$0xff] %v275_v5 }
  0x16   : > { %278 = vst [vmem:[%s219_s8 + $0x30] sm:$0xff] %v277_v6 }
  0x17   : > { %280 = vst [vmem:[%s219_s8 + $0x38] sm:$0xff] %v279_v7 }
  0x18 PF: > { %p1164_p6 = scmp.ge.s32.totalorder %s1381_s22, 1  ;;  %p295_p7 = scmp.lt.s32.totalorder %s1381_s22, 3 }
  0x1a   : > { %p296_p8 = pnand %p1164_p6, %p295_p7 }
  0x1b   : > { %s302_s9 = sand.u32 (!%p296_p8), 1, %s1365_s18   ;;  %p354_p9 = scmp.lt.s32.totalorder (!%p296_p8), %s1373_s20, 1 }
  0x1c   : > { %299 = sbr.rel (%p296_p8) target bundleno = 816 (0x330), region = 74  ;;  %s1165_s10 = sshll.u32 (!%p296_p8), %s302_s9, 6 }
  0x1d   : > { %s304_s11 = scalar_lea.vmem (!%p296_p8), [#allocation4], %s1165_s10  ;;  %s1387_s18 = smov (!%p296_p8), 16  }
  0x1e   : > { %s1167_s24 = sshll.u32 (!%p296_p8), %s1373_s20, 2 }
  0x1f   : > { %p1626_p10 = scmp.lt.s32.totalorder (!%p296_p8), %s1167_s24, 7 }
  0x21   : > { %v1383_v8 = vmov 0   ;;  %v1193_v9 = vld [vmem:[%s304_s11 + $0x30] sm:$0xff]  ;;  %v1191_v10 = vld [vmem:[%s304_s11 + $0x20] sm:$0xff]  ;;  %v1194_v12 = vld [vmem:[%s304_s11 + $0x38] sm:$0xff]  ;;  %s355_s12 = scalar_select %p354_p9, %s1373_s20, 1  ;;  %vm455_vm0 = vcmask 523264  }
  0x22   : > { %1287 = vset.pattern.permute.xlu1 %v1383_v8  ;;  %1286 = vset.pattern.permute.xlu0 %v1383_v8  ;;  %v409_v11 = vld [vmem:[%s304_s11 + $0x10] sm:$0xff]  ;;  %v1192_v13 = vld [vmem:[%s304_s11 + $0x28] sm:$0xff]  ;;  %v410_v14 = vld [vmem:[%s304_s11 + $0x18] sm:$0xff]  ;;  %vm372_vm1 = vcmask 7168   ;;  %v1384_v60 = vmov -inf   ;;  %vm381_vm2 = vcmask 138240  }
  0x23   : > { %1288 = vset.pattern.permute.xlu2 %v1383_v8  ;;  %636 = vperm.xlu0 %1286, %v1193_v9   ;;  %v408_v15 = vld [vmem:[%s304_s11 + $0x8] sm:$0xff]  ;;  %v407_v16 = vld [vmem:[%s304_s11] sm:$0xff]  ;;  %s1166_s13 = sshll.u32 %s355_s12, 3  ;;  %379 = vst.msk [vmem:[#allocation2 + $0x30] sm:$0xff] %vm372_vm1, %v1384_v60  ;;  %s1717_s24 = smov (!%p1626_p10, %s1167_s24), 7 }
  0x24   : > { %626 = vperm.xlu1 %1287, %v1191_v10   ;;  %424 = vperm.xlu2 %1288, %v409_v11   ;;  %s360_s16 = scalar_lea.vmem %s1698_s3, %s1166_s13  ;;  %v1292_v25 = vld [vmem:[%s1696_s1 + $0x1] ss:$0 sm:$0xff]  ;;  %v1293_v34 = vld [vmem:[%s1696_s1] ss:$0 sm:$0xff]  ;;  %373 = vst.msk [vmem:[#allocation2] sm:$0xff] %vm372_vm1, %v1384_v60  ;;  %s1168_s28 = sshll.u32 %s1717_s24, 2 }
  0x25   : > { %v390_v17 = vld [vmem:[%s360_s16] sm:$0xff]  ;;  %374 = vst.msk [vmem:[#allocation2 + $0x8] sm:$0xff] %vm372_vm1, %v1384_v60  ;;  %s365_s6 = scalar_lea.vmem %s1700_s5, %s1168_s28 }
  0x26   : > { %v393_v18 = vunpack.c.2.s8 %v390_v17  ;;  %v391_v19 = vunpack.c.0.s8 %v390_v17  ;;  %v392_v23 = vunpack.c.1.s8 %v390_v17  ;;  %v394_v24 = vunpack.c.3.s8 %v390_v17  ;;  %375 = vst.msk [vmem:[#allocation2 + $0x10] sm:$0xff] %vm372_vm1, %v1384_v60 }
  0x27   : > { %376 = vst.msk [vmem:[#allocation2 + $0x18] sm:$0xff] %vm372_vm1, %v1384_v60 }
  0x28   : > { %v397_v21 = vcvt.s32.f32 %v393_v18  ;;  %v395_v22 = vcvt.s32.f32 %v391_v19  ;;  %v396_v30 = vcvt.s32.f32 %v392_v23  ;;  %v398_v31 = vcvt.s32.f32 %v394_v24  ;;  %377 = vst.msk [vmem:[#allocation2 + $0x20] sm:$0xff] %vm372_vm1, %v1384_v60 }
  0x29   : > { %378 = vst.msk [vmem:[#allocation2 + $0x28] sm:$0xff] %vm372_vm1, %v1384_v60 }
  0x2a   : > { %v1171_v26 = vadd.f32 -1.0, %v397_v21  ;;  %v1169_v27 = vadd.f32 -1.0, %v395_v22  ;;  %v1170_v40 = vadd.f32 -1.0, %v396_v30  ;;  %v1172_v41 = vadd.f32 -1.0, %v398_v31  ;;  %380 = vst.msk [vmem:[#allocation2 + $0x38] sm:$0xff] %vm372_vm1, %v1384_v60  ;;  %v666_v21 = vld [vmem:[#allocation2 + $0x30] sm:$0xff] }
  0x2b   : > { %641 = vperm.xlu0 %1286, %v1194_v12  }
  0x2c   : > { %631 = vperm.xlu1 %1287, %v1192_v13   ;;  %429 = vperm.xlu2 %1288, %v410_v14   ;;  %v405_v35 = vmul.f32 1e+30, %v1171_v26  ;;  %v403_v38 = vmul.f32 1e+30, %v1169_v27  ;;  %v404_v50 = vmul.f32 1e+30, %v1170_v40 }
  0x2d   : > { %v406_v51 = vmul.f32 1e+30, %v1172_v41 }
  0x2f   : > { %v664_v22 = vld [vmem:[#allocation2 + $0x20] sm:$0xff] }
  0x31   : > { %v667_v30 = vld [vmem:[#allocation2 + $0x38] sm:$0xff] }
  0x33   : > { %414 = vperm.xlu0 %1286, %v407_v16  }
  0x34   : > { %419 = vperm.xlu1 %1287, %v408_v15  }
  0x7e   : > { %v425_v20 = vpop.permute.xlu2 %424 }
  0x7f   : > { %v437_v44 = vadd.f32 %v1293_v34, %v425_v20 }
  0x81   : > { %v441_v56 = vmul.f32 0.2, %v437_v44 }
  0x83   : > { %v445_v63 = vmax.f32 %v437_v44, %v441_v56 }
  0x85   : > { %v1499_v7 = vadd.f32 %v445_v63, %v405_v35 }
  0x86   : > { %v430_v39 = vpop.permute.xlu2 %429 }
  0x87   : > { %v438_v45 = vadd.f32 %v1293_v34, %v430_v39  ;;  %v462_v11 = vsel %vm455_vm0, %v1499_v7, -inf  ;;  %v454_v39 = vld [vmem:[#allocation2 + $0x18] sm:$0xff] }
  0x89   : > { %v442_v57 = vmul.f32 0.2, %v438_v45 }
  0x8b   : > { %v446_v0 = vmax.f32 %v438_v45, %v442_v57  ;;  %v452_v57 = vld [vmem:[#allocation2 + $0x8] sm:$0xff] }
  0x8d   : > { %v1501_v8 = vadd.f32 %v446_v0, %v406_v51 }
  0x8f   : > { %v465_v12 = vsel %vm455_vm0, %v1501_v8, -inf }
  0x95   : > { %v637_v28 = vpop.permute.xlu0 %636 }
  0x96   : > { %v627_v29 = vpop.permute.xlu1 %626  ;;  %v649_v32 = vadd.f32 %v1292_v25, %v637_v28 }
  0x97   : > { %v647_v33 = vadd.f32 %v1292_v25, %v627_v29  ;;  %v665_v29 = vld [vmem:[#allocation2 + $0x28] sm:$0xff] }
  0x98   : > { %v653_v36 = vmul.f32 0.2, %v649_v32 }
  0x99   : > { %v651_v37 = vmul.f32 0.2, %v647_v33 }
  0x9a   : > { %v657_v42 = vmax.f32 %v649_v32, %v653_v36 }
  0x9b   : > { %v655_v43 = vmax.f32 %v647_v33, %v651_v37 }
  0x9c   : > { %v1475_v46 = vadd.f32 %v657_v42, %v405_v35 }
  0x9d   : > { %v1477_v47 = vadd.f32 %v655_v43, %v403_v38  ;;  %v642_v48 = vpop.permute.xlu0 %641 }
  0x9e   : > { %v632_v49 = vpop.permute.xlu1 %631  ;;  %v650_v52 = vadd.f32 %v1292_v25, %v642_v48  ;;  %v674_v54 = vsel %vm455_vm0, %v1475_v46, -inf }
  0x9f   : > { %v648_v53 = vadd.f32 %v1292_v25, %v632_v49  ;;  %v668_v55 = vsel %vm455_vm0, %v1477_v47, -inf  ;;  %675 = vmax.xlane.f32.xlu2 %v674_v54 }
  0xa0   : > { %669 = vmax.xlane.f32.xlu1 %v668_v55  ;;  %v654_v58 = vmul.f32 0.2, %v650_v52 }
  0xa1   : > { %v652_v59 = vmul.f32 0.2, %v648_v53 }
  0xa2   : > { %v658_v61 = vmax.f32 %v650_v52, %v654_v58 }
  0xa3   : > { %v656_v62 = vmax.f32 %v648_v53, %v652_v59 }
  0xa4   : > { %v1489_v2 = vadd.f32 %v658_v61, %v406_v51 }
  0xa5   : > { %v1487_v1 = vadd.f32 %v656_v62, %v404_v50  ;;  %v415_v3 = vpop.permute.xlu0 %414 }
  0xa6   : > { %v435_v4 = vadd.f32 %v1293_v34, %v415_v3  ;;  %v677_v6 = vsel %vm455_vm0, %v1489_v2, -inf  ;;  %v420_v10 = vpop.permute.xlu1 %419 }
  0xa7   : > { %v671_v5 = vsel %vm455_vm0, %v1487_v1, -inf  ;;  %678 = vmax.xlane.f32.xlu0 %v677_v6  ;;  %v436_v13 = vadd.f32 %v1293_v34, %v420_v10 }
  0xa8   : > { %672 = vmax.xlane.f32.xlu2 %v671_v5  ;;  %v439_v9 = vmul.f32 0.2, %v435_v4 }
  0xa9   : > { %v440_v15 = vmul.f32 0.2, %v436_v13 }
  0xaa   : > { %v443_v14 = vmax.f32 %v435_v4, %v439_v9 }
  0xab   : > { %v444_v17 = vmax.f32 %v436_v13, %v440_v15  ;;  %v1385_v13 = vmov 0.0   ;;  %v1229_v15 = vld [vmem:[%s1697_s2 + $0x20] sm:$0xff] }
  0xac   : > { %v1507_v16 = vadd.f32 %v443_v14, %v403_v38  ;;  %v453_v38 = vld [vmem:[#allocation2 + $0x10] sm:$0xff]  ;;  %387 = vst.msk [vmem:[#allocation3 + $0x28] sm:$0xff] %vm381_vm2, %v1385_v13  ;;  %v1230_v14 = vld [vmem:[%s1697_s2 + $0x28] sm:$0xff] }
  0xad   : > { %v1511_v19 = vadd.f32 %v444_v17, %v404_v50  ;;  %v451_v50 = vld [vmem:[#allocation2] sm:$0xff]  ;;  %382 = vst.msk [vmem:[#allocation3] sm:$0xff] %vm381_vm2, %v1385_v13  ;;  %v1228_v17 = vld [vmem:[%s1697_s2 + $0x18] sm:$0xff] }
  0xae   : > { %v456_v18 = vsel %vm455_vm0, %v1507_v16, -inf  ;;  %383 = vst.msk [vmem:[#allocation3 + $0x8] sm:$0xff] %vm381_vm2, %v1385_v13  ;;  %1233 = vmatpush.bf16.msra.mxu2 %v1228_v17  ;;  %560 = vmatpush.bf16.msra.mxu0 %v1228_v17 }
  0xaf   : > { %466 = vmax.xlane.f32.xlu0 %v465_v12  ;;  %v459_v20 = vsel %vm455_vm0, %v1511_v19, -inf  ;;  %v1231_v12 = vld [vmem:[%s1697_s2 + $0x30] sm:$0xff]  ;;  %384 = vst.msk [vmem:[#allocation3 + $0x10] sm:$0xff] %vm381_vm2, %v1385_v13 }
  0xb0   : > { %463 = vmax.xlane.f32.xlu2 %v462_v11  ;;  %v1232_v11 = vld [vmem:[%s1697_s2 + $0x38] sm:$0xff]  ;;  %385 = vst.msk [vmem:[#allocation3 + $0x18] sm:$0xff] %vm381_vm2, %v1385_v13 }
  0xb1   : > { %1237 = vmatpush.bf16.msra.mxu3 %v1232_v11  ;;  %773 = vmatpush.bf16.msra.mxu1 %v1232_v11  ;;  %386 = vst.msk [vmem:[#allocation3 + $0x20] sm:$0xff] %vm381_vm2, %v1385_v13 }
  0xb2   : > { %388 = vst.msk [vmem:[#allocation3 + $0x30] sm:$0xff] %vm381_vm2, %v1385_v13 }
  0xb3   : > { %389 = vst.msk [vmem:[#allocation3 + $0x38] sm:$0xff] %vm381_vm2, %v1385_v13 }
  0xb5   : > { %1238 = vmatpush.bf16.msra.mxu3 %v1231_v12  ;;  %774 = vmatpush.bf16.msra.mxu1 %v1231_v12 }
  0xb7   : > { %457 = vmax.xlane.f32.xlu0 %v456_v18  ;;  %v1227_v18 = vld [vmem:[%s1697_s2 + $0x10] sm:$0xff] }
  0xb8   : > { %1234 = vmatpush.bf16.msra.mxu2 %v1227_v18  ;;  %561 = vmatpush.bf16.msra.mxu0 %v1227_v18 }
  0xb9   : > { %1239 = vmatpush.bf16.msra.mxu3 %v1230_v14  ;;  %775 = vmatpush.bf16.msra.mxu1 %v1230_v14 }
  0xbd   : > { %1240 = vmatpush.bf16.msra.mxu3 %v1229_v15  ;;  %776 = vmatpush.bf16.msra.mxu1 %v1229_v15  ;;  %v577_v15 = vld [vmem:[#allocation3 + $0x10] sm:$0xff] }
  0xbf   : > { %460 = vmax.xlane.f32.xlu0 %v459_v20  ;;  %v1226_v20 = vld [vmem:[%s1697_s2 + $0x8] sm:$0xff] }
  0xc0   : > { %1235 = vmatpush.bf16.msra.mxu2 %v1226_v20  ;;  %562 = vmatpush.bf16.msra.mxu0 %v1226_v20 }
 0x112   : > { %v676_v23 = vpop.xlane.xlu2 %675 }
 0x113   : > { %v670_v24 = vpop.xlane.xlu1 %669  ;;  %v682_v25 = vmax.f32 %v666_v21, %v676_v23 }
 0x114   : > { %v680_v26 = vmax.f32 %v664_v22, %v670_v24 }
 0x115   : > { %827 = vst.msk [vmem:[#allocation2 + $0x30] sm:$0xff] %vm372_vm1, %v682_v25  ;;  %708 = vperm.xlu1 %1287, %v682_v25   ;;  %v686_v54 = vsub.f32 %v666_v21, %v682_v25 }
 0x116   : > { %v684_v27 = vsub.f32 %v664_v22, %v680_v26  ;;  %698 = vperm.xlu0 %1286, %v680_v26   ;;  %825 = vst.msk [vmem:[#allocation2 + $0x20] sm:$0xff] %vm372_vm1, %v680_v26  ;;  %v1225_v22 = vld [vmem:[%s1697_s2] sm:$0xff] }
 0x117   : > { %v692_v58 = vmul.f32 1.442695, %v686_v54  ;;  %1236 = vmatpush.bf16.msra.mxu2 %v1225_v22  ;;  %563 = vmatpush.bf16.msra.mxu0 %v1225_v22  ;;  %v1386_v54 = vmov 16  }
 0x118   : > { %v688_v28 = vmul.f32 1.442695, %v684_v27 }
 0x11a   : > { %1295 = vpow2.f32 %v688_v28  ;;  %v679_v32 = vpop.xlane.xlu0 %678 }
 0x11b   : > { %v673_v31 = vpop.xlane.xlu2 %672  ;;  %v683_v34 = vmax.f32 %v667_v30, %v679_v32 }
 0x11c   : > { %v681_v33 = vmax.f32 %v665_v29, %v673_v31 }
 0x11d   : > { %v687_v35 = vsub.f32 %v667_v30, %v683_v34  ;;  %713 = vperm.xlu2 %1288, %v683_v34   ;;  %828 = vst.msk [vmem:[#allocation2 + $0x38] sm:$0xff] %vm372_vm1, %v683_v34 }
 0x11e   : > { %826 = vst.msk [vmem:[#allocation2 + $0x28] sm:$0xff] %vm372_vm1, %v681_v33  ;;  %703 = vperm.xlu1 %1287, %v681_v33   ;;  %v685_v45 = vsub.f32 %v665_v29, %v681_v33 }
 0x11f   : > { %v694_v36 = vmul.f32 1.442695, %v687_v35 }
 0x120   : > { %v1296_v37 = vpop.eup %1295  ;;  %v690_v51 = vmul.f32 1.442695, %v685_v45 }
 0x121   : > { %795 = vperm.xlu0 %1286, %v1296_v37   ;;  %1297 = vpow2.f32 %v694_v36 }
 0x122   : > { %v467_v41 = vpop.xlane.xlu0 %466 }
 0x123   : > { %v464_v40 = vpop.xlane.xlu2 %463  ;;  %v471_v43 = vmax.f32 %v454_v39, %v467_v41 }
 0x124   : > { %v470_v42 = vmax.f32 %v453_v38, %v464_v40 }
 0x125   : > { %616 = vst.msk [vmem:[#allocation2 + $0x18] sm:$0xff] %vm372_vm1, %v471_v43  ;;  %v475_v63 = vsub.f32 %v454_v39, %v471_v43 }
 0x126   : > { %v474_v44 = vsub.f32 %v453_v38, %v470_v42  ;;  %615 = vst.msk [vmem:[#allocation2 + $0x10] sm:$0xff] %vm372_vm1, %v470_v42  ;;  %496 = vperm.xlu2 %1288, %v470_v42   ;;  %501 = vperm.xlu1 %1287, %v471_v43  }
 0x127   : > { %v1298_v49 = vpop.eup %1297  ;;  %v482_v3 = vmul.f32 1.442695, %v475_v63 }
 0x128   : > { %v480_v48 = vmul.f32 1.442695, %v474_v44 }
 0x129   : > { %810 = vperm.xlu0 %1286, %v1298_v49  }
 0x12a   : > { %1299 = vpow2.f32 %v480_v48  ;;  %v458_v52 = vpop.xlane.xlu0 %457 }
 0x12b   : > { %v468_v53 = vmax.f32 %v451_v50, %v458_v52  ;;  %1301 = vpow2.f32 %v690_v51 }
 0x12c   : > { %1303 = vpow2.f32 %v692_v58 }
 0x12d   : > { %613 = vst.msk [vmem:[#allocation2] sm:$0xff] %vm372_vm1, %v468_v53  ;;  %v472_v55 = vsub.f32 %v451_v50, %v468_v53 }
 0x12e   : > { %486 = vperm.xlu2 %1288, %v468_v53  }
 0x12f   : > { %v476_v59 = vmul.f32 1.442695, %v472_v55  ;;  %v791_v55 = vld [vmem:[#allocation3 + $0x30] sm:$0xff] }
 0x130   : > { %v1300_v56 = vpop.eup %1299 }
 0x131   : > { %591 = vperm.xlu0 %1286, %v1300_v56   ;;  %v1302_v62 = vpop.eup %1301  ;;  %1305 = vpow2.f32 %v476_v59 }
 0x132   : > { %v461_v60 = vpop.xlane.xlu0 %460  ;;  %v1304_v5 = vpop.eup %1303  ;;  %1307 = vpow2.f32 %v482_v3  ;;  %v792_v3 = vld [vmem:[#allocation3 + $0x38] sm:$0xff] }
 0x133   : > { %v469_v61 = vmax.f32 %v452_v57, %v461_v60 }
 0x135   : > { %614 = vst.msk [vmem:[#allocation2 + $0x8] sm:$0xff] %vm372_vm1, %v469_v61  ;;  %491 = vperm.xlu1 %1287, %v469_v61   ;;  %v473_v0 = vsub.f32 %v452_v57, %v469_v61  ;;  %v789_v57 = vld [vmem:[#allocation3 + $0x20] sm:$0xff] }
 0x136   : > { %800 = vperm.xlu2 %1288, %v1302_v62  }
 0x137   : > { %v478_v4 = vmul.f32 1.442695, %v473_v0  ;;  %v1306_v6 = vpop.eup %1305 }
 0x138   : > { %v1308_v9 = vpop.eup %1307 }
 0x139   : > { %1309 = vpow2.f32 %v478_v4  ;;  %1290 = vset.pattern.permute.xlu0 %v1386_v54  ;;  %v790_v4 = vld [vmem:[#allocation3 + $0x28] sm:$0xff] }
 0x13d   : > { %805 = vperm.xlu1 %1287, %v1304_v5  }
 0x13e   : > { %581 = vperm.xlu2 %1288, %v1306_v6  }
 0x13f   : > { %v1310_v10 = vpop.eup %1309 }
 0x145   : > { %586 = vperm.xlu1 %1287, %v1310_v10  }
 0x146   : > { %596 = vperm.xlu2 %1288, %v1308_v9  }
 0x14d   : > { %1289 = vset.pattern.permute.xlu1 %v1386_v54 }
 0x14e   : > { %1291 = vset.pattern.permute.xlu2 %v1386_v54 }
 0x177   : > { %v714_v21 = vpop.permute.xlu2 %713 }
 0x178   : > { %v719_v23 = vsub.f32 %v1489_v2, %v714_v21 }
 0x17a   : > { %v726_v24 = vmul.f32 1.442695, %v719_v23  ;;  %v578_v23 = vld [vmem:[#allocation3 + $0x18] sm:$0xff] }
 0x17c   : > { %1311 = vpow2.f32 %v726_v24 }
 0x180   : > { %v497_v32 = vpop.permute.xlu2 %496 }
 0x181   : > { %v506_v36 = vsub.f32 %v1499_v7, %v497_v32 }
 0x182   : > { %v1312_v34 = vpop.eup %1311 }
 0x187   : > { %v709_v25 = vpop.permute.xlu1 %708 }
 0x188   : > { %v718_v26 = vsub.f32 %v1475_v46, %v709_v25  ;;  %v699_v27 = vpop.permute.xlu0 %698  ;;  %v512_v46 = vmul.f32 1.442695, %v506_v36 }
 0x189   : > { %v716_v29 = vsub.f32 %v1477_v47, %v699_v27  ;;  %v575_v27 = vld [vmem:[#allocation3] sm:$0xff] }
 0x18a   : > { %v724_v28 = vmul.f32 1.442695, %v718_v26 }
 0x18b   : > { %v720_v30 = vmul.f32 1.442695, %v716_v29 }
 0x18c   : > { %1313 = vpow2.f32 %v724_v28 }
 0x18d   : > { %1315 = vpow2.f32 %v720_v30 }
 0x190   : > { %v704_v31 = vpop.permute.xlu1 %703 }
 0x191   : > { %v717_v33 = vsub.f32 %v1487_v1, %v704_v31  ;;  %v487_v1 = vpop.permute.xlu2 %486 }
 0x192   : > { %v1314_v35 = vpop.eup %1313  ;;  %v504_v44 = vsub.f32 %v1507_v16, %v487_v1 }
 0x193   : > { %v722_v2 = vmul.f32 1.442695, %v717_v33  ;;  %v729_v37 = vpack.c.bf16 %v1312_v34, %v1314_v35  ;;  %v1316_v39 = vpop.eup %1315  ;;  %v796_v16 = vpop.permute.xlu0 %795  ;;  %v576_v35 = vld [vmem:[#allocation3 + $0x8] sm:$0xff] }
 0x194   : > { %v508_v48 = vmul.f32 1.442695, %v504_v44 }
 0x195   : > { %1317 = vpow2.f32 %v722_v2  ;;  %1221 = vmatmul.msk.bf16.vlgmr.msra.gmra.mxu3 %vm455_vm0, %v729_v37 }
 0x196   : > { %1319 = vpow2.f32 %v512_v46 }
 0x198   : > { %v502_v38 = vpop.permute.xlu1 %501 }
 0x199   : > { %v507_v47 = vsub.f32 %v1501_v8, %v502_v38  ;;  %v801_v59 = vpop.permute.xlu2 %800 }
 0x19a   : > { %v814_v9 = vmul.f32 %v801_v59, %v790_v4 }
 0x19b   : > { %v1318_v40 = vpop.eup %1317  ;;  %v514_v41 = vmul.f32 1.442695, %v507_v47  ;;  %v811_v62 = vpop.permute.xlu0 %810 }
 0x19c   : > { %v728_v42 = vpack.c.bf16 %v1318_v40, %v1316_v39  ;;  %v1320_v43 = vpop.eup %1319  ;;  %v816_v5 = vmul.f32 %v811_v62, %v792_v3 }
 0x19d   : > { %1321 = vpow2.f32 %v514_v41 }
 0x19e   : > { %1220 = vmatmul.msk.bf16.vlgmr.msra.gmra.mxu1 %vm455_vm0, %v728_v42  ;;  %1323 = vpow2.f32 %v508_v48 }
 0x1a1   : > { %v582_v11 = vpop.permute.xlu2 %581 }
 0x1a2   : > { %v599_v30 = vmul.f32 %v582_v11, %v575_v27 }
 0x1a3   : > { %v1322_v7 = vpop.eup %1321  ;;  %v592_v17 = vpop.permute.xlu0 %591 }
 0x1a4   : > { %v517_v45 = vpack.c.bf16 %v1322_v7, %v1320_v43  ;;  %v1324_v51 = vpop.eup %1323  ;;  %v601_v20 = vmul.f32 %v592_v17, %v577_v15 }
 0x1a6   : > { %1190 = vmatmul.msk.bf16.vlgmr.msra.gmra.mxu2 %vm455_vm0, %v517_v45 }
 0x1a7   : > { %v492_v49 = vpop.permute.xlu1 %491 }
 0x1a8   : > { %v505_v8 = vsub.f32 %v1511_v19, %v492_v49  ;;  %v813_v19 = vmul.f32 %v796_v16, %v789_v57 }
 0x1a9   : > { %v597_v24 = vpop.permute.xlu2 %596 }
 0x1aa   : > { %v510_v50 = vmul.f32 1.442695, %v505_v8  ;;  %v602_v28 = vmul.f32 %v597_v24, %v578_v23 }
 0x1ac   : > { %1325 = vpow2.f32 %v510_v50 }
 0x1af   : > { %v806_v56 = vpop.permute.xlu1 %805 }
 0x1b0   : > { %v815_v58 = vmul.f32 %v806_v56, %v791_v55 }
 0x1b2   : > { %v1326_v52 = vpop.eup %1325 }
 0x1b3   : > { %v516_v53 = vpack.c.bf16 %v1326_v52, %v1324_v51 }
 0x1b5   : > { %1189 = vmatmul.msk.bf16.vlgmr.msra.gmra.mxu0 %vm455_vm0, %v516_v53 }
 0x1b7   : > { %v587_v2 = vpop.permute.xlu1 %586 }
 0x1b8   : > { %v600_v36 = vmul.f32 %v587_v2, %v576_v35 }
 0x218   : > { %v783_v60 = vpop.f32.mrf.mxu3 }
 0x219   : > { %v819_v61 = vadd.f32 %v815_v58, %v783_v60 }
 0x21b   : > { %v778_v63 = vpop.f32.mrf.mxu1  ;;  %823 = vst.msk [vmem:[#allocation3 + $0x30] sm:$0xff] %vm381_vm2, %v819_v61 }
 0x21c   : > { %v817_v0 = vadd.f32 %v813_v19, %v778_v63 }
 0x21e   : > { %821 = vst.msk [vmem:[#allocation3 + $0x20] sm:$0xff] %vm381_vm2, %v817_v0 }
 0x220   : > { %v785_v6 = vpop.f32.mrf.mxu3 }
 0x221   : > { %v820_v10 = vadd.f32 %v816_v5, %v785_v6 }
 0x222   : > { %v918_v13 = vld [vmem:[#allocation3 + $0x30] sm:$0xff] }
 0x223   : > { %v780_v12 = vpop.f32.mrf.mxu1  ;;  %824 = vst.msk [vmem:[#allocation3 + $0x38] sm:$0xff] %vm381_vm2, %v820_v10  ;;  %932 = vperm.xlu2 %1291, %v918_v13  }
 0x224   : > { %v818_v14 = vadd.f32 %v814_v9, %v780_v12 }
 0x225   : > { %v1570_v18 = vld [vmem:[#allocation3 + $0x20] sm:$0xff] }
 0x226   : > { %822 = vst.msk [vmem:[#allocation3 + $0x28] sm:$0xff] %vm381_vm2, %v818_v14  ;;  %922 = vperm.xlu1 %1289, %v1570_v18  }
 0x229   : > { %v570_v21 = vpop.f32.mrf.mxu2 }
 0x22a   : > { %v605_v22 = vadd.f32 %v601_v20, %v570_v21  ;;  %v1577_v26 = vld [vmem:[#allocation3 + $0x38] sm:$0xff] }
 0x22c   : > { %610 = vst.msk [vmem:[#allocation3 + $0x10] sm:$0xff] %vm381_vm2, %v605_v22 }
 0x22d   : > { %v1575_v25 = vld [vmem:[#allocation3 + $0x28] sm:$0xff] }
 0x22e   : > { %927 = vperm.xlu0 %1290, %v1575_v25   ;;  %937 = vperm.xlu1 %1289, %v1577_v26  }
 0x231   : > { %v572_v29 = vpop.f32.mrf.mxu2 }
 0x232   : > { %v606_v31 = vadd.f32 %v602_v28, %v572_v29  ;;  %v565_v32 = vpop.f32.mrf.mxu0 }
 0x233   : > { %v603_v33 = vadd.f32 %v599_v30, %v565_v32  ;;  %v1582_v34 = vld [vmem:[#allocation3 + $0x10] sm:$0xff] }
 0x234   : > { %611 = vst.msk [vmem:[#allocation3 + $0x18] sm:$0xff] %vm381_vm2, %v606_v31 }
 0x235   : > { %608 = vst.msk [vmem:[#allocation3] sm:$0xff] %vm381_vm2, %v603_v33 }
 0x236   : > { %848 = vperm.xlu0 %1290, %v1582_v34  }
 0x23a   : > { %v567_v37 = vpop.f32.mrf.mxu0 }
 0x23b   : > { %v604_v46 = vadd.f32 %v600_v36, %v567_v37  ;;  %v1590_v47 = vld [vmem:[#allocation3 + $0x18] sm:$0xff] }
 0x23c   : > { %v1586_v38 = vld [vmem:[#allocation3] sm:$0xff] }
 0x23d   : > { %609 = vst.msk [vmem:[#allocation3 + $0x8] sm:$0xff] %vm381_vm2, %v604_v46  ;;  %838 = vperm.xlu2 %1291, %v1586_v38  }
 0x244   : > { %v1592_v39 = vld [vmem:[#allocation3 + $0x8] sm:$0xff] }
 0x245   : > { %853 = vperm.xlu2 %1291, %v1590_v47   ;;  %843 = vperm.xlu1 %1289, %v1592_v39  }
 0x27d   : > { %v933_v40 = vpop.permute.xlu2 %932 }
 0x27e   : > { %1327 = vrcp.f32 %v933_v40  ;;  %v981_v43 = vand.u32 2147483648, %v933_v40  ;;  %v979_v44 = vand.u32 2147483647, %v933_v40  ;;  %vm975_vm4 = vweird.f32 %v933_v40 }
 0x280   : > { %v982_v48 = vor.u32 1.1754944e-38, %v981_v43  ;;  %vm980_vm6 = vcmp.eq.f32.partialorder %v979_v44, 8.507059e+37 }
 0x284   : > { %v1328_v41 = vpop.eup %1327 }
 0x285   : > { %v971_v42 = vmul.f32 %v1328_v41, %v933_v40  ;;  %vm976_vm3 = vweird.f32 %v1328_v41 }
 0x286   : > { %vm977_vm5 = vmor %vm975_vm4, %vm976_vm3 }
 0x287   : > { %v972_v1 = vsub.f32 1.0, %v971_v42 }
 0x289   : > { %v973_v7 = vmul.f32 %v1328_v41, %v972_v1 }
 0x28b   : > { %v974_v45 = vadd.f32 %v1328_v41, %v973_v7 }
 0x28d   : > { %v978_v49 = vsel %vm977_vm5, %v1328_v41, %v974_v45 }
 0x28e   : > { %v983_v8 = vsel %vm980_vm6, %v982_v48, %v978_v49 }
 0x28f   : > { %v984_v50 = vmul.f32 %v983_v8, %v918_v13 }
 0x291   : > { %1008 = vrot.lane.b32.xlu2 %v984_v50, %s1387_s18 }
 0x297   : > { %v839_v29 = vpop.permute.xlu2 %838 }
 0x298   : > { %v923_v51 = vpop.permute.xlu1 %922  ;;  %v867_v45 = vand.u32 2147483648, %v839_v29  ;;  %vm861_vm4 = vweird.f32 %v839_v29  ;;  %v865_v48 = vand.u32 2147483647, %v839_v29 }
 0x299   : > { %1329 = vrcp.f32 %v923_v51  ;;  %v951_v57 = vand.u32 2147483648, %v923_v51  ;;  %v949_v58 = vand.u32 2147483647, %v923_v51  ;;  %vm945_vm8 = vweird.f32 %v923_v51 }
 0x29b   : > { %v952_v61 = vor.u32 1.1754944e-38, %v951_v57  ;;  %vm950_vm10 = vcmp.eq.f32.partialorder %v949_v58, 8.507059e+37 }
 0x29f   : > { %v1330_v52 = vpop.eup %1329  ;;  %v1603_v31 = vpop.permute.xlu2 %853 }
 0x2a0   : > { %v938_v53 = vpop.permute.xlu1 %937  ;;  %v941_v54 = vmul.f32 %v1330_v52, %v923_v51  ;;  %v928_v16 = vpop.permute.xlu0 %927  ;;  %vm946_vm7 = vweird.f32 %v1330_v52 }
 0x2a1   : > { %1331 = vrcp.f32 %v938_v53  ;;  %vm947_vm9 = vmor %vm945_vm8, %vm946_vm7  ;;  %v996_v5 = vand.u32 2147483648, %v938_v53  ;;  %v966_v11 = vand.u32 2147483648, %v928_v16  ;;  %v994_v12 = vand.u32 2147483647, %v938_v53 }
 0x2a2   : > { %v942_v55 = vsub.f32 1.0, %v941_v54  ;;  %1333 = vrcp.f32 %v928_v16  ;;  %v964_v14 = vand.u32 2147483647, %v928_v16  ;;  %vm990_vm13 = vweird.f32 %v938_v53 }
 0x2a3   : > { %v997_v17 = vor.u32 1.1754944e-38, %v996_v5  ;;  %vm960_vm14 = vweird.f32 %v928_v16  ;;  %v967_v21 = vor.u32 1.1754944e-38, %v966_v11  ;;  %vm995_vm0 = vcmp.eq.f32.partialorder %v994_v12, 8.507059e+37 }
 0x2a4   : > { %v943_v56 = vmul.f32 %v1330_v52, %v942_v55  ;;  %vm965_vm2 = vcmp.eq.f32.partialorder %v964_v14, 8.507059e+37  ;;  %1335 = vrcp.f32 %v839_v29  ;;  %v868_v54 = vor.u32 1.1754944e-38, %v867_v45 }
 0x2a5   : > { %vm866_vm8 = vcmp.eq.f32.partialorder %v865_v48, 8.507059e+37 }
 0x2a6   : > { %v944_v59 = vadd.f32 %v1330_v52, %v943_v56 }
 0x2a7   : > { %v1332_v60 = vpop.eup %1331 }
 0x2a8   : > { %v1334_v19 = vpop.eup %1333  ;;  %v986_v62 = vmul.f32 %v1332_v60, %v938_v53  ;;  %v948_v63 = vsel %vm947_vm9, %v1330_v52, %v944_v59  ;;  %vm991_vm11 = vweird.f32 %v1332_v60  ;;  %v849_v30 = vpop.permute.xlu0 %848 }
 0x2a9   : > { %v956_v0 = vmul.f32 %v1334_v19, %v928_v16  ;;  %v953_v4 = vsel %vm950_vm10, %v952_v61, %v948_v63  ;;  %vm961_vm12 = vweird.f32 %v1334_v19  ;;  %vm992_vm15 = vmor %vm990_vm13, %vm991_vm11  ;;  %1337 = vrcp.f32 %v849_v30 }
 0x2aa   : > { %v987_v3 = vsub.f32 1.0, %v986_v62  ;;  %v954_v9 = vmul.f32 %v953_v4, %v1570_v18  ;;  %vm962_vm1 = vmor %vm960_vm14, %vm961_vm12  ;;  %v1336_v33 = vpop.eup %1335  ;;  %1339 = vrcp.f32 %v1603_v31  ;;  %v897_v51 = vand.u32 2147483648, %v849_v30 }
 0x2ab   : > { %v957_v6 = vsub.f32 1.0, %v956_v0  ;;  %v857_v35 = vmul.f32 %v1336_v33, %v839_v29  ;;  %vm862_vm3 = vweird.f32 %v1336_v33  ;;  %vm891_vm7 = vweird.f32 %v849_v30 }
 0x2ac   : > { %v988_v10 = vmul.f32 %v1332_v60, %v987_v3  ;;  %1004 = vrot.lane.b32.xlu1 %v954_v9, %s1387_s18  ;;  %vm1618_vm5 = vmor %vm861_vm4, %vm862_vm3  ;;  %v895_v16 = vand.u32 2147483647, %v849_v30  ;;  %vm906_vm10 = vweird.f32 %v1603_v31  ;;  %v898_v59 = vor.u32 1.1754944e-38, %v897_v51 }
 0x2ad   : > { %v958_v13 = vmul.f32 %v1334_v19, %v957_v6  ;;  %v858_v36 = vsub.f32 1.0, %v857_v35  ;;  %v912_v61 = vand.u32 2147483648, %v1603_v31  ;;  %v1294_v6 = vld [vmem:[%s1699_s4] ss:$0 sm:$0xff]  ;;  %vm1037_vm4 = vcmask 257024  }
 0x2ae   : > { %v989_v15 = vadd.f32 %v1332_v60, %v988_v10  ;;  %vm896_vm13 = vcmp.eq.f32.partialorder %v895_v16, 8.507059e+37 }
 0x2af   : > { %v959_v20 = vadd.f32 %v1334_v19, %v958_v13  ;;  %v859_v40 = vmul.f32 %v1336_v33, %v858_v36  ;;  %v913_v13 = vor.u32 1.1754944e-38, %v912_v61 }
 0x2b0   : > { %v993_v22 = vsel %vm992_vm15, %v1332_v60, %v989_v15 }
 0x2b1   : > { %v998_v18 = vsel %vm995_vm0, %v997_v17, %v993_v22  ;;  %v963_v23 = vsel %vm962_vm1, %v1334_v19, %v959_v20  ;;  %v860_v43 = vadd.f32 %v1336_v33, %v859_v40  ;;  %v910_v19 = vand.u32 2147483647, %v1603_v31 }
 0x2b2   : > { %v999_v24 = vmul.f32 %v998_v18, %v1577_v26  ;;  %v968_v27 = vsel %vm965_vm2, %v967_v21, %v963_v23  ;;  %v1338_v26 = vpop.eup %1337  ;;  %vm1016_vm1 = vcmask 130048  }
 0x2b3   : > { %v969_v28 = vmul.f32 %v968_v27, %v1575_v25  ;;  %v887_v25 = vmul.f32 %v1338_v26, %v849_v30  ;;  %v1609_v2 = vpop.eup %1339  ;;  %vm892_vm6 = vweird.f32 %v1338_v26  ;;  %v864_v53 = vsel %vm1618_vm5, %v1336_v33, %v860_v43 }
 0x2b4   : > { %1010 = vrot.lane.b32.xlu1 %v999_v24, %s1387_s18  ;;  %v902_v41 = vmul.f32 %v1609_v2, %v1603_v31  ;;  %vm1630_vm9 = vmor %vm891_vm7, %vm892_vm6  ;;  %vm907_vm11 = vweird.f32 %v1609_v2  ;;  %v869_v57 = vsel %vm866_vm8, %v868_v54, %v864_v53  ;;  %vm911_vm2 = vcmp.eq.f32.partialorder %v910_v19, 8.507059e+37 }
 0x2b5   : > { %1006 = vrot.lane.b32.xlu0 %v969_v28, %s1387_s18  ;;  %v888_v46 = vsub.f32 1.0, %v887_v25  ;;  %vm1646_vm14 = vmor %vm906_vm10, %vm907_vm11  ;;  %v870_v4 = vmul.f32 %v869_v57, %v1586_v38 }
 0x2b6   : > { %v903_v7 = vsub.f32 1.0, %v902_v41 }
 0x2b7   : > { %v1605_v32 = vpop.permute.xlu1 %843  ;;  %v889_v1 = vmul.f32 %v1338_v26, %v888_v46 }
 0x2b8   : > { %1341 = vrcp.f32 %v1605_v32  ;;  %v904_v50 = vmul.f32 %v1609_v2, %v903_v7  ;;  %v882_v62 = vand.u32 2147483648, %v1605_v32  ;;  %vm876_vm15 = vweird.f32 %v1605_v32 }
 0x2b9   : > { %v890_v8 = vadd.f32 %v1338_v26, %v889_v1  ;;  %v880_v0 = vand.u32 2147483647, %v1605_v32 }
 0x2ba   : > { %v905_v58 = vadd.f32 %v1609_v2, %v904_v50  ;;  %v883_v14 = vor.u32 1.1754944e-38, %v882_v62 }
 0x2bb   : > { %v894_v56 = vsel %vm1630_vm9, %v1338_v26, %v890_v8  ;;  %vm881_vm3 = vcmp.eq.f32.partialorder %v880_v0, 8.507059e+37 }
 0x2bc   : > { %v899_v3 = vsel %vm896_vm13, %v898_v59, %v894_v56  ;;  %v909_v12 = vsel %vm1646_vm14, %v1609_v2, %v905_v58 }
 0x2bd   : > { %v900_v15 = vmul.f32 %v899_v3, %v1582_v34  ;;  %v914_v22 = vsel %vm911_vm2, %v913_v13, %v909_v12 }
 0x2be   : > { %v1611_v37 = vpop.eup %1341  ;;  %v915_v27 = vmul.f32 %v914_v22, %v1590_v47 }
 0x2bf   : > { %v872_v42 = vmul.f32 %v1611_v37, %v1605_v32  ;;  %vm877_vm12 = vweird.f32 %v1611_v37 }
 0x2c0   : > { %vm1653_vm0 = vmor %vm876_vm15, %vm877_vm12 }
 0x2c1   : > { %v873_v44 = vsub.f32 1.0, %v872_v42 }
 0x2c3   : > { %v874_v52 = vmul.f32 %v1611_v37, %v873_v44 }
 0x2c5   : > { %v875_v60 = vadd.f32 %v1611_v37, %v874_v52 }
 0x2c7   : > { %v879_v38 = vsel %vm1653_vm0, %v1611_v37, %v875_v60 }
 0x2c8   : > { %v884_v18 = vsel %vm881_vm3, %v883_v14, %v879_v38 }
 0x2c9   : > { %v885_v34 = vmul.f32 %v884_v18, %v1592_v39 }
 0x2eb   : > { %v1009_v10 = vpop.permute.xlu2 %1008 }
 0x2ec   : > { %v1019_v20 = vsel %vm1016_vm1, %v900_v15, %v1009_v10 }
 0x2ed   : > { %v1027_v24 = vadd.f32 %v1294_v6, %v1019_v20 }
 0x2ef   : > { %v1031_v26 = vmax.f32 %v1027_v24, 0.0 }
 0x2f1   : > { %v1035_v36 = vpack.c.bf16 %v1031_v26, %v1031_v26 }
 0x2f3   : > { %1040 = vst.msk [vmem:[%s365_s6 + $0x8] sm:$0xf] %vm1037_vm4, %v1035_v36 }
 0x31e   : > { %v1005_v9 = vpop.permute.xlu1 %1004 }
 0x31f   : > { %v1017_v11 = vsel %vm1016_vm1, %v870_v4, %v1005_v9 }
 0x320   : > { %v1025_v17 = vadd.f32 %v1294_v6, %v1017_v11 }
 0x322   : > { %v1029_v21 = vmax.f32 %v1025_v17, 0.0 }
 0x324   : > { %v1033_v23 = vpack.c.bf16 %v1029_v21, %v1029_v21 }
 0x326   : > { %1038 = vst.msk [vmem:[%s365_s6] sm:$0xf] %vm1037_vm4, %v1033_v23  ;;  %v1011_v28 = vpop.permute.xlu1 %1010 }
 0x327   : > { %v1007_v29 = vpop.permute.xlu0 %1006  ;;  %v1020_v30 = vsel %vm1016_vm1, %v915_v27, %v1011_v28 }
 0x328   : > { %v1018_v31 = vsel %vm1016_vm1, %v885_v34, %v1007_v29  ;;  %v1028_v32 = vadd.f32 %v1294_v6, %v1020_v30 }
 0x329   : > { %v1026_v33 = vadd.f32 %v1294_v6, %v1018_v31 }
 0x32a   : > { %v1032_v35 = vmax.f32 %v1028_v32, 0.0 }
 0x32b   : > { %v1030_v25 = vmax.f32 %v1026_v33, 0.0 }
 0x32c   : > { %v1036_v37 = vpack.c.bf16 %v1032_v35, %v1032_v35 }
 0x32d   : > { %v1034_v2 = vpack.c.bf16 %v1030_v25, %v1030_v25 }
 0x32e   : > { %1041 = vst.msk [vmem:[%s365_s6 + $0xc] sm:$0xf] %vm1037_vm4, %v1036_v37 }
 0x32f   : > { %1039 = vst.msk [vmem:[%s365_s6 + $0x4] sm:$0xf] %vm1037_vm4, %v1034_v2 }
 0x330 PF: > { %s15_s22 = sadd.s32 1, %s1381_s22   ;;  %s1710_s18 = smov %s1369_s19 }
 0x331   : > { %p12_p11 = scmp.ge.s32.totalorder %s15_s22, 4   ;;  %s1711_s19 = smov %s1453_s26 }
 0x332   : > { %s1712_s20 = smov %s1377_s21  ;;  %s1713_s21 = smov %s1715_s23 }
 0x333   :  { %14 = sbr.rel (!%p12_p11) target bundleno = 3 (0x3), region = 135 }

</bundles_post_ra>
